<compile_context>
chip_gen: v7x
topology: tpu7x:2x2x1
jax: 0.10.0
libtpu: 0.0.40
codegen_flags: <defaults>
</compile_context>

<pallas_src>
import functools

import jax
import jax.numpy as jnp
import numpy as np
from jax.experimental import pallas as pl
from jax.experimental.pallas import tpu as pltpu

_BN_EPS = 1e-5
_LANE = 128


def _round_up(n, m):
    return (n + m - 1) // m * m


# ------------------------------ Pallas kernels --------------------------------

def _bn_stats_kernel(x_ref, sum_ref, sumsq_ref):
    """Per-feature batch sum and sum-of-squares, accumulated across batch tiles."""
    x = x_ref[...]
    s = jnp.sum(x, axis=0, keepdims=True)
    s2 = jnp.sum(x * x, axis=0, keepdims=True)

    @pl.when(pl.program_id(0) == 0)
    def _():
        sum_ref[...] = s
        sumsq_ref[...] = s2

    @pl.when(pl.program_id(0) != 0)
    def _():
        sum_ref[...] += s
        sumsq_ref[...] += s2


def _vae_fwd_kernel(xsum_ref, xsqsum_ref, bn_w_ref, bn_b_ref,
                    x_ref, eps_ref,
                    w1_ref, b1_ref, w23_ref, b23_ref,
                    w4_ref, b4_ref, w5_ref, b5_ref,
                    xr_ref, mulv_ref,
                    *, inv_b, z_pad):
    # --- bn1: BatchNorm1d (training mode) folded to one FMA from precomputed sums.
    # NOTE: one-pass variance (E[x^2]-mean^2) clamped at 0; adequate for
    # normalized inputs, can lose precision if |mean| >> std.
    mean = xsum_ref[...] * inv_b                                 # [1, F]
    var = jnp.maximum(xsqsum_ref[...] * inv_b - mean * mean, 0.0)
    scale = jax.lax.rsqrt(var + _BN_EPS) * bn_w_ref[...]         # gamma folded in
    shift = bn_b_ref[...] - mean * scale                         # beta folded in
    x_hat = (x_ref[...] * scale + shift).astype(jnp.bfloat16)    # [TB, F]

    # --- encode: h = relu(fc1(x_hat)); [mu | log_var] = fused fc23(h)
    h = jnp.dot(x_hat, w1_ref[...],
                preferred_element_type=jnp.float32) + b1_ref[...]
    h = jnp.maximum(h, 0.0)

    mu_lv = jnp.dot(h.astype(jnp.bfloat16), w23_ref[...],
                    preferred_element_type=jnp.float32) + b23_ref[...]  # [TB, 2*Zp]
    mu = mu_lv[:, :z_pad]          # lane-128-aligned slices -> free views
    log_var = mu_lv[:, z_pad:]

    # --- reparameterize: z = mu + eps * exp(log_var / 2)
    z = mu + eps_ref[...] * jnp.exp(log_var * 0.5)

    # --- decode: x_reconst = sigmoid(fc5(relu(fc4(z))))
    h2 = jnp.dot(z.astype(jnp.bfloat16), w4_ref[...],
                 preferred_element_type=jnp.float32) + b4_ref[...]
    h2 = jnp.maximum(h2, 0.0)
    logits = jnp.dot(h2.astype(jnp.bfloat16), w5_ref[...],
                     preferred_element_type=jnp.float32) + b5_ref[...]

    # Two lane-dense unmasked stores; sigmoid(t) = 0.5*(tanh(t/2)+1) on the EUP.
    xr_ref[...] = (0.5 * (jnp.tanh(logits * 0.5) + 1.0)).astype(xr_ref.dtype)
    mulv_ref[...] = mu_lv.astype(mulv_ref.dtype)


# ------------------------------- Python wrapper --------------------------------

def vae_forward(x, eps, params):
    """Fused VAE forward. x: [B, input_size], eps: [B, z_dim].

    Returns (x_reconst [B, encode_size], mu [B, z_dim], log_var [B, z_dim]).
    """
    dims = params["dims"]
    input_size, encode_size = dims["input_size"], dims["encode_size"]
    z_dim = dims["z_dim"]

    B = x.shape[0]
    F_pad = params["w1"].shape[0]
    H_pad = params["w1"].shape[1]
    Z_pad = params["w4"].shape[0]
    E_pad = params["w5"].shape[1]

    tile_b = min(256, _round_up(B, 16))
    B_pad = _round_up(B, tile_b)
    n_tiles = B_pad // tile_b

    # Zero padding is exact: padded rows/lanes contribute nothing (see kernel).
    x_pad = jnp.pad(x.astype(jnp.float32),
                    ((0, B_pad - B), (0, F_pad - input_size)))
    eps_pad = jnp.pad(eps.astype(jnp.float32),
                      ((0, B_pad - B), (0, Z_pad - z_dim)))

    # --- pass 1: batch statistics (reduction grid axis).
    xsum, xsqsum = pl.pallas_call(
        _bn_stats_kernel,
        out_shape=(jax.ShapeDtypeStruct((1, F_pad), jnp.float32),
                   jax.ShapeDtypeStruct((1, F_pad), jnp.float32)),
        grid=(n_tiles,),
        in_specs=[pl.BlockSpec((tile_b, F_pad), lambda i: (i, 0))],
        out_specs=(pl.BlockSpec((1, F_pad), lambda i: (0, 0)),
                   pl.BlockSpec((1, F_pad), lambda i: (0, 0))),
        compiler_params=pltpu.CompilerParams(
            dimension_semantics=("arbitrary",)),
    )(x_pad)

    args = (xsum, xsqsum, params["bn_w"], params["bn_b"], x_pad, eps_pad,
            params["w1"], params["b1"], params["w23"], params["b23"],
            params["w4"], params["b4"], params["w5"], params["b5"])

    flops = 2 * B_pad * (F_pad * H_pad + H_pad * 2 * Z_pad
                         + Z_pad * H_pad + H_pad * E_pad)
    transcendentals = B_pad * (Z_pad + E_pad)
    bytes_accessed = int(sum(int(a.size) * a.dtype.itemsize for a in args)
                         + B_pad * (E_pad + 2 * Z_pad) * 4)

    # --- pass 2: per-row forward, parallel over batch tiles.
    out_x, out_mulv = pl.pallas_call(
        functools.partial(_vae_fwd_kernel, inv_b=1.0 / B, z_pad=Z_pad),
        out_shape=(jax.ShapeDtypeStruct((B_pad, E_pad), jnp.float32),
                   jax.ShapeDtypeStruct((B_pad, 2 * Z_pad), jnp.float32)),
        grid=(n_tiles,),
        in_specs=[
            pl.BlockSpec((1, F_pad), lambda i: (0, 0)),          # xsum
            pl.BlockSpec((1, F_pad), lambda i: (0, 0)),          # xsqsum
            pl.BlockSpec((1, F_pad), lambda i: (0, 0)),          # bn gamma
            pl.BlockSpec((1, F_pad), lambda i: (0, 0)),          # bn beta
            pl.BlockSpec((tile_b, F_pad), lambda i: (i, 0)),     # x
            pl.BlockSpec((tile_b, Z_pad), lambda i: (i, 0)),     # eps
            pl.BlockSpec((F_pad, H_pad), lambda i: (0, 0)),      # w1 (resident)
            pl.BlockSpec((1, H_pad), lambda i: (0, 0)),          # b1
            pl.BlockSpec((H_pad, 2 * Z_pad), lambda i: (0, 0)),  # w23 (resident)
            pl.BlockSpec((1, 2 * Z_pad), lambda i: (0, 0)),      # b23
            pl.BlockSpec((Z_pad, H_pad), lambda i: (0, 0)),      # w4 (resident)
            pl.BlockSpec((1, H_pad), lambda i: (0, 0)),          # b4
            pl.BlockSpec((H_pad, E_pad), lambda i: (0, 0)),      # w5 (resident)
            pl.BlockSpec((1, E_pad), lambda i: (0, 0)),          # b5
        ],
        out_specs=(pl.BlockSpec((tile_b, E_pad), lambda i: (i, 0)),
                   pl.BlockSpec((tile_b, 2 * Z_pad), lambda i: (i, 0))),
        compiler_params=pltpu.CompilerParams(
            dimension_semantics=("parallel",)),
        cost_estimate=pl.CostEstimate(flops=flops,
                                      transcendentals=transcendentals,
                                      bytes_accessed=bytes_accessed),
    )(*args)

    x_reconst = out_x[:B, :encode_size]
    mu = out_mulv[:B, :z_dim]
    log_var = out_mulv[:B, Z_pad:Z_pad + z_dim]
    return x_reconst, mu, log_var


# ---------------------------- deterministic params -----------------------------

def init_params(key, input_size, encode_size, h_dim, z_dim):
    """nn.Linear / nn.BatchNorm1d-shaped params, zero-padded to 128-lane multiples.

    Linear weights are stored transposed as [in_pad, out_pad] in bfloat16; biases
    and BN affine params stay f32 as [1, out_pad].  fc2/fc3 are fused into one
    [h_pad, 2*z_pad] weight with mu in lanes [0, z_pad) and log_var in
    [z_pad, 2*z_pad) so the in-kernel head slices are tile-aligned.
    """
    F_pad = _round_up(input_size, _LANE)
    H_pad = _round_up(h_dim, _LANE)
    Z_pad = _round_up(z_dim, _LANE)
    E_pad = _round_up(encode_size, _LANE)

    def linear(k, fan_in, fan_out, in_pad, out_pad):
        kw, kb = jax.random.split(k)
        bound = 1.0 / float(np.sqrt(fan_in))
        w = jax.random.uniform(kw, (fan_in, fan_out), jnp.float32, -bound, bound)
        b = jax.random.uniform(kb, (1, fan_out), jnp.float32, -bound, bound)
        w = jnp.pad(w, ((0, in_pad - fan_in), (0, out_pad - fan_out)))
        b = jnp.pad(b, ((0, 0), (0, out_pad - fan_out)))
        return w.astype(jnp.bfloat16), b

    k1, k2, k3, k4, k5 = jax.random.split(key, 5)
    w1, b1 = linear(k1, input_size, h_dim, F_pad, H_pad)
    w2, b2 = linear(k2, h_dim, z_dim, H_pad, Z_pad)
    w3, b3 = linear(k3, h_dim, z_dim, H_pad, Z_pad)
    w4, b4 = linear(k4, z_dim, h_dim, Z_pad, H_pad)
    w5, b5 = linear(k5, h_dim, encode_size, H_pad, E_pad)

    bn_w = jnp.pad(jnp.ones((1, input_size), jnp.float32),
                   ((0, 0), (0, F_pad - input_size)))               # gamma (pad=0)
    bn_b = jnp.zeros((1, F_pad), jnp.float32)                       # beta

    return {
        "bn_w": bn_w, "bn_b": bn_b,
        "w1": w1, "b1": b1,
        "w23": jnp.concatenate([w2, w3], axis=1),                   # [H_pad, 2*Z_pad]
        "b23": jnp.concatenate([b2, b3], axis=1),                   # [1, 2*Z_pad]
        "w4": w4, "b4": b4,
        "w5": w5, "b5": b5,
        "dims": {"input_size": input_size, "encode_size": encode_size,
                 "h_dim": h_dim, "z_dim": z_dim},
    }


# ---------------------------- pure-JAX reference -------------------------------

def vae_reference(x, eps, params):
    dims = params["dims"]
    isz, esz, hd, zd = (dims["input_size"], dims["encode_size"],
                        dims["h_dim"], dims["z_dim"])
    Z_pad = params["w4"].shape[0]
    f32 = lambda a: a.astype(jnp.float32)
    w1 = f32(params["w1"])[:isz, :hd]; b1 = params["b1"][:, :hd]
    w2 = f32(params["w23"])[:hd, :zd]; b2 = params["b23"][:, :zd]
    w3 = f32(params["w23"])[:hd, Z_pad:Z_pad + zd]
    b3 = params["b23"][:, Z_pad:Z_pad + zd]
    w4 = f32(params["w4"])[:zd, :hd]; b4 = params["b4"][:, :hd]
    w5 = f32(params["w5"])[:hd, :esz]; b5 = params["b5"][:, :esz]

    mean = jnp.mean(x, axis=0, keepdims=True)
    var = jnp.mean((x - mean) ** 2, axis=0, keepdims=True)
    x_hat = (x - mean) * jax.lax.rsqrt(var + _BN_EPS)   # gamma=1, beta=0
    h = jax.nn.relu(x_hat @ w1 + b1)
    mu = h @ w2 + b2
    log_var = h @ w3 + b3
    z = mu + eps * jnp.exp(log_var / 2)
    h2 = jax.nn.relu(z @ w4 + b4)
    x_reconst = jax.nn.sigmoid(h2 @ w5 + b5)
    return x_reconst, mu, log_var


# ------------------------------------ main -------------------------------------

if __name__ == "__main__":
    # Small shapes consistent with VAE(input_size, encode_size, h_dim=400, z_dim=20),
    # scaled down: input_size=16, encode_size=16, h_dim=32, z_dim=8, batch=8.
    B, INPUT_SIZE, ENCODE_SIZE, H_DIM, Z_DIM = 8, 16, 16, 32, 8

    root = jax.random.PRNGKey(0)
    k_x, k_eps, k_params = jax.random.split(root, 3)

    x = jax.random.normal(k_x, (B, INPUT_SIZE), jnp.float32)
    eps = jax.random.normal(k_eps, (B, Z_DIM), jnp.float32)   # torch.randn_like(std)
    params = init_params(k_params, INPUT_SIZE, ENCODE_SIZE, H_DIM, Z_DIM)

    x_reconst, mu, log_var = jax.block_until_ready(vae_forward(x, eps, params))

    assert x_reconst.shape == (B, ENCODE_SIZE)
    assert mu.shape == (B, Z_DIM) and log_var.shape == (B, Z_DIM)
    assert bool(jnp.all(jnp.isfinite(x_reconst)))
    assert bool(jnp.all(jnp.isfinite(mu))) and bool(jnp.all(jnp.isfinite(log_var)))
    assert bool(jnp.all((x_reconst >= 0.0) & (x_reconst <= 1.0)))

    # Pure-JAX reference (same stored weights, f32 activations); loose tolerance
    # covers the kernel's bf16 activation casts.
    xr_ref, mu_ref, lv_ref = vae_reference(x, eps, params)
    np.testing.assert_allclose(np.asarray(x_reconst), np.asarray(xr_ref),
                               rtol=5e-2, atol=5e-2)
    np.testing.assert_allclose(np.asarray(mu), np.asarray(mu_ref),
                               rtol=5e-2, atol=5e-2)
    np.testing.assert_allclose(np.asarray(log_var), np.asarray(lv_ref),
                               rtol=5e-2, atol=5e-2)

    print("KERNEL_OK")
</pallas_src>

<mosaic_0001>
module attributes {stable_mosaic.version = 11 : i64} {
  func.func @_bn_stats_kernel(%arg0: i32, %arg1: memref<16x128xf32, #tpu.memory_space<vmem>>, %arg2: memref<1x128xf32, #tpu.memory_space<vmem>>, %arg3: memref<1x128xf32, #tpu.memory_space<vmem>>) attributes {dimension_semantics = [#tpu.dimension_semantics<arbitrary>], iteration_bounds = array<i64: 1>, scalar_prefetch = 0 : i64, scratch_operands = 0 : i64, tpu.core_type = #tpu.core_type<tc>, window_params = [{transform_indices = @transform_0, window_bounds = array<i64: 16, 128>}, {pipeline_mode = #tpu.pipeline_mode<synchronous>, transform_indices = @transform_1, window_bounds = array<i64: 1, 128>}, {pipeline_mode = #tpu.pipeline_mode<synchronous>, transform_indices = @transform_2, window_bounds = array<i64: 1, 128>}]} {
    %c0 = arith.constant 0 : index
    %c0_0 = arith.constant 0 : index
    %0 = vector.load %arg1[%c0, %c0_0] : memref<16x128xf32, #tpu.memory_space<vmem>>, vector<16x128xf32>
    %cst = arith.constant dense<0.000000e+00> : vector<128xf32>
    %1 = vector.multi_reduction <add>, %0, %cst [0] : vector<16x128xf32> to vector<128xf32>
    %2 = vector.shape_cast %1 : vector<128xf32> to vector<1x128xf32>
    %3 = arith.mulf %0, %0 : vector<16x128xf32>
    %cst_1 = arith.constant dense<0.000000e+00> : vector<128xf32>
    %4 = vector.multi_reduction <add>, %3, %cst_1 [0] : vector<16x128xf32> to vector<128xf32>
    %5 = vector.shape_cast %4 : vector<128xf32> to vector<1x128xf32>
    %c0_i32 = arith.constant 0 : i32
    %6 = arith.cmpi eq, %arg0, %c0_i32 : i32
    %7 = arith.extui %6 : i1 to i32
    %c0_i32_2 = arith.constant 0 : i32
    %8 = arith.cmpi ne, %7, %c0_i32_2 : i32
    scf.if %8 {
      %c0_5 = arith.constant 0 : index
      %c0_6 = arith.constant 0 : index
      %12 = vector.load %arg2[%c0_5, %c0_6] : memref<1x128xf32, #tpu.memory_space<vmem>>, vector<1x128xf32>
      tpu.vector_store %arg2[%c0_5, %c0_6], %2 {strides = array<i32>} : memref<1x128xf32, #tpu.memory_space<vmem>>, vector<1x128xf32>,
      %c0_7 = arith.constant 0 : index
      %c0_8 = arith.constant 0 : index
      %13 = vector.load %arg3[%c0_7, %c0_8] : memref<1x128xf32, #tpu.memory_space<vmem>>, vector<1x128xf32>
      tpu.vector_store %arg3[%c0_7, %c0_8], %5 {strides = array<i32>} : memref<1x128xf32, #tpu.memory_space<vmem>>, vector<1x128xf32>,
    } else {
    }
    %c0_i32_3 = arith.constant 0 : i32
    %9 = arith.cmpi ne, %arg0, %c0_i32_3 : i32
    %10 = arith.extui %9 : i1 to i32
    %c0_i32_4 = arith.constant 0 : i32
    %11 = arith.cmpi ne, %10, %c0_i32_4 : i32
    scf.if %11 {
      %c0_5 = arith.constant 0 : index
      %c0_6 = arith.constant 0 : index
      %12 = vector.load %arg2[%c0_5, %c0_6] : memref<1x128xf32, #tpu.memory_space<vmem>>, vector<1x128xf32>
      %13 = arith.addf %12, %2 : vector<1x128xf32>
      %c0_7 = arith.constant 0 : index
      %c0_8 = arith.constant 0 : index
      %14 = vector.load %arg2[%c0_7, %c0_8] : memref<1x128xf32, #tpu.memory_space<vmem>>, vector<1x128xf32>
      tpu.vector_store %arg2[%c0_7, %c0_8], %13 {strides = array<i32>} : memref<1x128xf32, #tpu.memory_space<vmem>>, vector<1x128xf32>,
      %c0_9 = arith.constant 0 : index
      %c0_10 = arith.constant 0 : index
      %15 = vector.load %arg3[%c0_9, %c0_10] : memref<1x128xf32, #tpu.memory_space<vmem>>, vector<1x128xf32>
      %16 = arith.addf %15, %5 : vector<1x128xf32>
      %c0_11 = arith.constant 0 : index
      %c0_12 = arith.constant 0 : index
      %17 = vector.load %arg3[%c0_11, %c0_12] : memref<1x128xf32, #tpu.memory_space<vmem>>, vector<1x128xf32>
      tpu.vector_store %arg3[%c0_11, %c0_12], %16 {strides = array<i32>} : memref<1x128xf32, #tpu.memory_space<vmem>>, vector<1x128xf32>,
    } else {
    }
    return
  }
  func.func @transform_0(%arg0: i32) -> (i32, i32) {
    %c0_i32 = arith.constant 0 : i32
    %c0_i32_0 = arith.constant 0 : i32
    return %arg0, %c0_i32 : i32, i32
  }
  func.func @transform_1(%arg0: i32) -> (i32, i32) {
    %c0_i32 = arith.constant 0 : i32
    %c0_i32_0 = arith.constant 0 : i32
    %c0_i32_1 = arith.constant 0 : i32
    return %c0_i32, %c0_i32_0 : i32, i32
  }
  func.func @transform_2(%arg0: i32) -> (i32, i32) {
    %c0_i32 = arith.constant 0 : i32
    %c0_i32_0 = arith.constant 0 : i32
    %c0_i32_1 = arith.constant 0 : i32
    return %c0_i32, %c0_i32_0 : i32, i32
  }
}

</mosaic_0001>

<bundles_post_ra>
// kernel: tpu_custom_call.1
= control target key start
LH: loop header
LB: loop body
LE: loop exit
PB: predicated region body
PF: predicated region fallthrough
CT: control target
= control target key end

     0   :  { %8 = vsyncpa [#allocation3], 0  ;;  %s230_s0 = inlined_call_operand.hbm [shape: f32[16,128], index: 0, kind: input, shape index: {}]   ;;  %s231_s1 = inlined_call_operand.hbm [shape: f32[1,128], index: 1, kind: output, shape index: {0}]   ;;  %s232_s2 = inlined_call_operand.hbm [shape: f32[1,128], index: 2, kind: output, shape index: {1}]  }
   0x1   :  { %9 = vsyncpa [#allocation4], 0 }
   0x2   :  { %10 = vsyncpa [#allocation7], 0  ;;  %s166_s9 = smov [#allocation2]   ;;  %s94_s13 = scalar_lea.hbm %s230_s0, 256 }
   0x3   :  { %s16_s10 = sshll.u32 %s166_s9, 4  ;;  %p95_p0 = scmp.ne.s32.totalorder %s230_s0, %s94_s13  ;;  %s17_s10 = int_to_ptr.vmem [resolvable:$true] %s16_s10 }
   0x4   :  { %p98_p1 = scmp.lt.u32.totalorder %s94_s13, %s230_s0 }
   0x6   :  { %p100_p2 = pnand %p98_p1, %p95_p0 }
   0x8   :  { %103 = shalt.err (!%p100_p2)
}
   0x9   :  { %s104_s18 = scalar_lea.vmem %s17_s10, 256  ;;  %p109_p4 = scmp.lt.s32.totalorder %s17_s10, %s17_s10 }
   0xa   :  { %p105_p3 = scmp.ne.s32.totalorder %s17_s10, %s104_s18  ;;  %p110_p5 = scmp.lt.s32.totalorder %s104_s18, %s104_s18 }
   0xc   :  { %p111_p6 = por %p110_p5, %p109_p4 }
   0xe   :  { %p112_p7 = pnand %p111_p6, %p105_p3 }
  0x10   :  { %115 = shalt.err (!%p112_p7)
}
  0x11   :  { %s167_s19 = smov 128   ;;  %s168_s20 = smov 8  }
  0x12   :  { %22 = dma.hbm_to_vmem [thread:$0]  %s230_s0, 256, %s17_s10, [#allocation3], %s167_s19, %s167_s19, %s168_s20  }
  0x13   :  { %160 = dma.done.wait [#allocation3], 256  }
  0x14   :  { %161 = vsyncadd [#allocation3], 4294967040  ;;  %v26_v0 = vld [vmem:[#allocation2] sm:$0xff]  ;;  %v27_v1 = vld [vmem:[#allocation2 + $0x8] sm:$0xff]  ;;  %s169_s23 = smov [#allocation5]   ;;  %s170_s0 = smov [#allocation6]  }
  0x15   :  { %v28_v2 = vadd.f32 %v27_v1, %v26_v0  ;;  %v35_v3 = vmul.f32 %v26_v0, %v26_v0  ;;  %v36_v4 = vmul.f32 %v27_v1, %v27_v1  ;;  %s66_s24 = sshll.u32 %s169_s23, 4  ;;  %s76_s25 = sshll.u32 %s170_s0, 4  ;;  %s67_s24 = int_to_ptr.vmem [resolvable:$true] %s66_s24  ;;  %s198_s25 = int_to_ptr.vmem [resolvable:$true] %s76_s25 }
  0x16   :  { %s116_s26 = scalar_lea.vmem %s67_s24, 16  ;;  %s120_s27 = scalar_lea.vmem %s67_s24, 32 }
  0x17   :  { %v29_v5 = vrot.slane %v28_v2, 4  ;;  %v37_v6 = vadd.f32 %v36_v4, %v35_v3  ;;  %p117_p8 = scmp.ne.s32.totalorder %s67_s24, %s116_s26  ;;  %p121_p9 = scmp.lt.s32.totalorder %s67_s24, %s67_s24 }
  0x18   :  { %p122_p10 = scmp.lt.s32.totalorder %s120_s27, %s116_s26 }
  0x19   :  { %v30_v7 = vadd.f32 %v29_v5, %v28_v2  ;;  %v38_v8 = vrot.slane %v37_v6, 4 }
  0x1a   :  { %p123_p11 = por %p122_p10, %p121_p9 }
  0x1b   :  { %v31_v9 = vrot.slane %v30_v7, 2  ;;  %v39_v10 = vadd.f32 %v38_v8, %v37_v6 }
  0x1c   :  { %p124_p12 = pnand %p123_p11, %p117_p8 }
  0x1d   :  { %v32_v11 = vadd.f32 %v31_v9, %v30_v7  ;;  %v40_v12 = vrot.slane %v39_v10, 2 }
  0x1f   :  { %v33_v13 = vrot.slane %v32_v11, 1  ;;  %v41_v14 = vadd.f32 %v40_v12, %v39_v10 }
  0x21   :  { %v34_v15 = vadd.f32 %v33_v13, %v32_v11  ;;  %v42_v16 = vrot.slane %v41_v14, 1 }
  0x23   :  { %48 = vst [vmem:[#allocation5] sm:$0x1] %v34_v15  ;;  %v43_v17 = vadd.f32 %v42_v16, %v41_v14 }
  0x24   :  { %127 = shalt.err (!%p124_p12)
}
  0x25   :  { %s128_s30 = scalar_lea.hbm %s231_s1, 16 }
  0x26   :  { %p129_p13 = scmp.ne.s32.totalorder %s231_s1, %s128_s30  ;;  %p132_p0 = scmp.lt.u32.totalorder %s128_s30, %s231_s1 }
  0x28   :  { %p134_p1 = pnand %p132_p0, %p129_p13 }
  0x2a   :  { %137 = shalt.err (!%p134_p1)
}
  0x2b   :  { %69 = dma.vmem_to_hbm [thread:$0]  %s67_s24, 16, %s231_s1, [#allocation4]   ;;  %49 = vst [vmem:[#allocation6] sm:$0x1] %v43_v17 }
  0x2c   :  { %s138_s9 = scalar_lea.vmem %s198_s25, 16  ;;  %s142_s10 = scalar_lea.vmem %s198_s25, 32 }
  0x2d   :  { %p139_p2 = scmp.ne.s32.totalorder %s198_s25, %s138_s9  ;;  %p143_p3 = scmp.lt.s32.totalorder %s198_s25, %s198_s25 }
  0x2e   :  { %p144_p4 = scmp.lt.s32.totalorder %s142_s10, %s138_s9 }
  0x30   :  { %p145_p5 = por %p144_p4, %p143_p3 }
  0x32   :  { %p146_p6 = pnand %p145_p5, %p139_p2 }
  0x34   :  { %149 = shalt.err (!%p146_p6)
}
  0x35   :  { %s150_s13 = scalar_lea.hbm %s232_s2, 16 }
  0x36   :  { %p151_p7 = scmp.ne.s32.totalorder %s232_s2, %s150_s13  ;;  %p154_p8 = scmp.lt.u32.totalorder %s150_s13, %s232_s2 }
  0x38   :  { %p156_p9 = pnand %p154_p8, %p151_p7 }
  0x3a   :  { %159 = shalt.err (!%p156_p9)
}
  0x3b   :  { %79 = dma.vmem_to_hbm [thread:$0]  %s198_s25, 16, %s232_s2, [#allocation7]  }
  0x3c   :  { %162 = dma.done.wait [#allocation4], 16  }
  0x3d   :  { %163 = vsyncadd [#allocation4], 4294967280 }
  0x3e   :  { %164 = dma.done.wait [#allocation7], 16  }
  0x3f   :  { %165 = vsyncadd [#allocation7], 4294967280 }
  0x40   :  { %86 = vsyncpa [#allocation3], 1 }
  0x41   :  { %87 = vsyncpa [#allocation4], 1 }
  0x42   :  { %88 = vsyncpa [#allocation7], 1 }

</bundles_post_ra>
